<compile_context>
chip_gen: v6e
topology: v6e:2x2x1
jax: 0.10.0
libtpu: 0.0.40
codegen_flags: <defaults>
</compile_context>

<pallas_src>
import math

import jax
import jax.numpy as jnp
from jax.experimental import pallas as pl
from jax.experimental.pallas import tpu as pltpu

# ------------------------- problem sizes (small) -------------------------
B = 2            # batch
S = 8            # sequence length
E = 32           # embed_size
H = 4            # heads
D = E // H       # head dim
FWD = 4          # forward_expansion
F = FWD * E      # ffn hidden
N = B * S        # batch folded into rows (sublanes)
HN = H * N       # head-stacked rows
EPS = 1e-5       # nn.LayerNorm default eps
NEG_INF = -1e20


def _layernorm(x, gamma, beta):
    mu = jnp.mean(x, axis=-1, keepdims=True)
    var = jnp.mean((x - mu) ** 2, axis=-1, keepdims=True)
    return (x - mu) * jax.lax.rsqrt(var + EPS) * gamma + beta


def encoder_kernel(qkv_ref, bias_ref, wqkvo_ref, w1_ref, w2_ref, pvec_ref, out_ref):
    """Single invocation (no grid). Shapes:
      qkv_ref   (3, N, E)   rows ordered [q, k, v], batch folded: row = b*S + s
      bias_ref  (HN, HN)    additive mask bias, rows/cols ordered (h, b, s)
      wqkvo_ref (4, E, E)   [Wq, Wk, Wv, Wo]
      w1_ref    (E, F), w2_ref (F, E)
      pvec_ref  (10, F)     rows 0..8 = bq,bk,bv,bo,g1,be1,g2,be2,b2 (lanes 0:E),
                            row 9 = b1 (full F lanes)
      out_ref   (N, E)
    """
    f32 = jnp.float32
    q = qkv_ref[0]           # (N, E)
    k = qkv_ref[1]
    v = qkv_ref[2]

    wq, wk, wv, wo = wqkvo_ref[0], wqkvo_ref[1], wqkvo_ref[2], wqkvo_ref[3]

    bq = pvec_ref[0:1, 0:E]
    bk = pvec_ref[1:2, 0:E]
    bv = pvec_ref[2:3, 0:E]
    bo = pvec_ref[3:4, 0:E]
    g1 = pvec_ref[4:5, 0:E]
    be1 = pvec_ref[5:6, 0:E]
    g2 = pvec_ref[6:7, 0:E]
    be2 = pvec_ref[7:8, 0:E]
    b2 = pvec_ref[8:9, 0:E]
    b1 = pvec_ref[9:10, :]   # (1, F)

    # --- input projections (MXU), whole batch at once ---
    qp = jnp.dot(q, wq, preferred_element_type=f32) + bq   # (N, E)
    kp = jnp.dot(k, wk, preferred_element_type=f32) + bk
    vp = jnp.dot(v, wv, preferred_element_type=f32) + bv

    # --- stack heads along rows: (N, E) -> (H*N, D), row order (h, b, s) ---
    qh = jnp.concatenate([qp[:, h * D:(h + 1) * D] for h in range(H)], axis=0)
    kh = jnp.concatenate([kp[:, h * D:(h + 1) * D] for h in range(H)], axis=0)
    vh = jnp.concatenate([vp[:, h * D:(h + 1) * D] for h in range(H)], axis=0)

    # --- one fused attention: block-diag structure handled by additive bias ---
    scores = jax.lax.dot_general(qh, kh, (((1,), (1,)), ((), ())),
                                 preferred_element_type=f32)          # (HN, HN)
    scores = scores * (1.0 / math.sqrt(D)) + bias_ref[...]

    smax = jnp.max(scores, axis=-1, keepdims=True)   # per-row max is a valid shift
    p = jnp.exp(scores - smax)                       # masked entries underflow to 0
    denom = jnp.sum(p, axis=-1, keepdims=True)
    ctx = jnp.dot(p, vh, preferred_element_type=f32) / denom          # (HN, D)
    # TODO(synk): pl.reciprocal(denom, approx=True) would hit the EUP, but its
    # approximation error is marginal against the 1e-4 check; keep exact divide.

    # --- un-stack heads back into lanes: (H*N, D) -> (N, E) ---
    attn = jnp.concatenate([ctx[h * N:(h + 1) * N, :] for h in range(H)], axis=1)
    attn = jnp.dot(attn, wo, preferred_element_type=f32) + bo         # (N, E)

    # --- residual + LayerNorm1 (dropout == identity) ---
    x = _layernorm(attn + q, g1, be1)

    # --- feed forward ---
    hid = jnp.maximum(jnp.dot(x, w1_ref[...], preferred_element_type=f32) + b1, 0.0)
    ff = jnp.dot(hid, w2_ref[...], preferred_element_type=f32) + b2

    # --- residual + LayerNorm2 (dropout == identity) ---
    out_ref[...] = _layernorm(ff + x, g2, be2).astype(out_ref.dtype)


def _build_attention_bias(mask):
    """(B,S,S) keep-mask -> (HN, HN) additive bias with row/col order (h, b, s).

    Encodes head-block-diagonality, batch-block-diagonality and the user mask
    in one precomputed f32 tensor so the kernel just adds it.
    """
    mask_hb = jnp.tile(mask.astype(jnp.float32), (H, 1, 1))          # (H*B, S, S)
    eye_g = jnp.eye(H * B, dtype=jnp.float32)                        # (H*B, H*B)
    keep = eye_g[:, :, None, None] * mask_hb[:, None, :, :]          # (HB, HB, S, S)
    keep = keep.transpose(0, 2, 1, 3).reshape(HN, HN)                # (h,b,s) x (h',b',t)
    return jnp.where(keep > 0, 0.0, NEG_INF).astype(jnp.float32)


def encoder_forward(value, key, query, mask, params):
    """value/key/query: (B,S,E) f32, mask: (B,S,S) f32 (1 keep / 0 masked)."""
    # ---- wrapper-side packing (one-time XLA ops, outside the kernel) ----
    qkv = jnp.stack([query.reshape(N, E),
                     key.reshape(N, E),
                     value.reshape(N, E)]).astype(jnp.float32)        # (3, N, E)

    bias = _build_attention_bias(mask)                                # (HN, HN)

    wqkvo = jnp.stack([params["wq"], params["wk"],
                       params["wv"], params["wo"]]).astype(jnp.float32)  # (4, E, E)

    vec9 = jnp.stack([params[n].reshape(E) for n in
                      ("bq", "bk", "bv", "bo", "g1", "be1", "g2", "be2", "b2")])
    pvec = jnp.zeros((10, F), jnp.float32)
    pvec = pvec.at[0:9, 0:E].set(vec9.astype(jnp.float32))
    pvec = pvec.at[9, :].set(params["b1"].reshape(F).astype(jnp.float32))

    vmem = pl.BlockSpec(memory_space=pltpu.MemorySpace.VMEM)
    out = pl.pallas_call(
        encoder_kernel,
        out_shape=jax.ShapeDtypeStruct((N, E), jnp.float32),
        in_specs=[vmem] * 6,
        out_specs=vmem,
    )(qkv, bias, wqkvo, params["w1"], params["w2"], pvec)
    return out.reshape(B, S, E)


# ---------------------- pure-JAX reference (for checking) ----------------------
def encoder_reference(value, key, query, mask, p):
    qp = query @ p["wq"] + p["bq"]
    kp = key @ p["wk"] + p["bk"]
    vp = value @ p["wv"] + p["bv"]

    def split(x):  # (B,S,E) -> (B,H,S,D)
        return x.reshape(B, S, H, D).transpose(0, 2, 1, 3)

    qh, kh, vh = split(qp), split(kp), split(vp)
    scores = jnp.einsum("bhsd,bhtd->bhst", qh, kh) / math.sqrt(D)
    scores = jnp.where(mask[:, None, :, :] > 0, scores, NEG_INF)
    attn = jax.nn.softmax(scores, axis=-1)
    out = jnp.einsum("bhst,bhtd->bhsd", attn, vh)
    out = out.transpose(0, 2, 1, 3).reshape(B, S, E)
    out = out @ p["wo"] + p["bo"]

    def ln(x, g, b):
        mu = x.mean(-1, keepdims=True)
        var = ((x - mu) ** 2).mean(-1, keepdims=True)
        return (x - mu) * jax.lax.rsqrt(var + EPS) * g + b

    x = ln(out + query, p["g1"], p["be1"])
    save = x
    h1 = jnp.maximum(x @ p["w1"] + p["b1"], 0.0)
    ff = h1 @ p["w2"] + p["b2"]
    return ln(ff + save, p["g2"], p["be2"])


def init_params(rng):
    keys = jax.random.split(rng, 8)
    scl = 0.05
    params = {
        "wq": jax.random.normal(keys[0], (E, E), jnp.float32) * scl,
        "wk": jax.random.normal(keys[1], (E, E), jnp.float32) * scl,
        "wv": jax.random.normal(keys[2], (E, E), jnp.float32) * scl,
        "wo": jax.random.normal(keys[3], (E, E), jnp.float32) * scl,
        "bq": jnp.zeros((1, E), jnp.float32),
        "bk": jnp.zeros((1, E), jnp.float32),
        "bv": jnp.zeros((1, E), jnp.float32),
        "bo": jnp.zeros((1, E), jnp.float32),
        "g1": jnp.ones((1, E), jnp.float32),
        "be1": jnp.zeros((1, E), jnp.float32),
        "g2": jnp.ones((1, E), jnp.float32),
        "be2": jnp.zeros((1, E), jnp.float32),
        "w1": jax.random.normal(keys[4], (E, F), jnp.float32) * scl,
        "b1": jnp.full((1, F), 0.01, jnp.float32),
        "w2": jax.random.normal(keys[5], (F, E), jnp.float32) * scl,
        "b2": jnp.full((1, E), 0.01, jnp.float32),
    }
    return params


if __name__ == "__main__":
    root = jax.random.PRNGKey(0)
    k_v, k_k, k_q, k_p = jax.random.split(root, 4)

    value = jax.random.normal(k_v, (B, S, E), jnp.float32)
    key = jax.random.normal(k_k, (B, S, E), jnp.float32)
    query = jax.random.normal(k_q, (B, S, E), jnp.float32)
    # causal mask: 1 = attend, 0 = masked
    mask = jnp.broadcast_to(jnp.tril(jnp.ones((S, S), jnp.float32)), (B, S, S))

    params = init_params(k_p)

    out = encoder_forward(value, key, query, mask, params)
    out = jax.block_until_ready(out)

    ref = encoder_reference(value, key, query, mask, params)
    assert out.shape == (B, S, E)
    assert jnp.allclose(out, ref, atol=1e-4, rtol=1e-4), \
        f"max err {jnp.max(jnp.abs(out - ref))}"

    print("KERNEL_OK")
</pallas_src>

<mosaic_0001>
module attributes {stable_mosaic.version = 11 : i64} {
  func.func @encoder_kernel(%arg0: memref<3x16x32xf32, #tpu.memory_space<vmem>>, %arg1: memref<64x64xf32, #tpu.memory_space<vmem>>, %arg2: memref<4x32x32xf32, #tpu.memory_space<vmem>>, %arg3: memref<32x128xf32, #tpu.memory_space<vmem>>, %arg4: memref<128x32xf32, #tpu.memory_space<vmem>>, %arg5: memref<10x128xf32, #tpu.memory_space<vmem>>, %arg6: memref<16x32xf32, #tpu.memory_space<vmem>>) attributes {dimension_semantics = [], scalar_prefetch = 0 : i64, scratch_operands = 0 : i64, tpu.core_type = #tpu.core_type<tc>} {
    %c0 = arith.constant 0 : index
    %c0_0 = arith.constant 0 : index
    %c0_1 = arith.constant 0 : index
    %0 = vector.load %arg0[%c0, %c0_0, %c0_1] : memref<3x16x32xf32, #tpu.memory_space<vmem>>, vector<1x16x32xf32>
    %1 = vector.shape_cast %0 : vector<1x16x32xf32> to vector<16x32xf32>
    %c1 = arith.constant 1 : index
    %c0_2 = arith.constant 0 : index
    %c0_3 = arith.constant 0 : index
    %2 = vector.load %arg0[%c1, %c0_2, %c0_3] : memref<3x16x32xf32, #tpu.memory_space<vmem>>, vector<1x16x32xf32>
    %3 = vector.shape_cast %2 : vector<1x16x32xf32> to vector<16x32xf32>
    %c2 = arith.constant 2 : index
    %c0_4 = arith.constant 0 : index
    %c0_5 = arith.constant 0 : index
    %4 = vector.load %arg0[%c2, %c0_4, %c0_5] : memref<3x16x32xf32, #tpu.memory_space<vmem>>, vector<1x16x32xf32>
    %5 = vector.shape_cast %4 : vector<1x16x32xf32> to vector<16x32xf32>
    %c0_6 = arith.constant 0 : index
    %c0_7 = arith.constant 0 : index
    %c0_8 = arith.constant 0 : index
    %6 = vector.load %arg2[%c0_6, %c0_7, %c0_8] : memref<4x32x32xf32, #tpu.memory_space<vmem>>, vector<1x32x32xf32>
    %7 = vector.shape_cast %6 : vector<1x32x32xf32> to vector<32x32xf32>
    %c1_9 = arith.constant 1 : index
    %c0_10 = arith.constant 0 : index
    %c0_11 = arith.constant 0 : index
    %8 = vector.load %arg2[%c1_9, %c0_10, %c0_11] : memref<4x32x32xf32, #tpu.memory_space<vmem>>, vector<1x32x32xf32>
    %9 = vector.shape_cast %8 : vector<1x32x32xf32> to vector<32x32xf32>
    %c2_12 = arith.constant 2 : index
    %c0_13 = arith.constant 0 : index
    %c0_14 = arith.constant 0 : index
    %10 = vector.load %arg2[%c2_12, %c0_13, %c0_14] : memref<4x32x32xf32, #tpu.memory_space<vmem>>, vector<1x32x32xf32>
    %11 = vector.shape_cast %10 : vector<1x32x32xf32> to vector<32x32xf32>
    %c3 = arith.constant 3 : index
    %c0_15 = arith.constant 0 : index
    %c0_16 = arith.constant 0 : index
    %12 = vector.load %arg2[%c3, %c0_15, %c0_16] : memref<4x32x32xf32, #tpu.memory_space<vmem>>, vector<1x32x32xf32>
    %13 = vector.shape_cast %12 : vector<1x32x32xf32> to vector<32x32xf32>
    %c0_17 = arith.constant 0 : index
    %c0_18 = arith.constant 0 : index
    %14 = vector.load %arg5[%c0_17, %c0_18] : memref<10x128xf32, #tpu.memory_space<vmem>>, vector<1x32xf32>
    %c1_19 = arith.constant 1 : index
    %c0_20 = arith.constant 0 : index
    %15 = vector.load %arg5[%c1_19, %c0_20] : memref<10x128xf32, #tpu.memory_space<vmem>>, vector<1x32xf32>
    %c2_21 = arith.constant 2 : index
    %c0_22 = arith.constant 0 : index
    %16 = vector.load %arg5[%c2_21, %c0_22] : memref<10x128xf32, #tpu.memory_space<vmem>>, vector<1x32xf32>
    %c3_23 = arith.constant 3 : index
    %c0_24 = arith.constant 0 : index
    %17 = vector.load %arg5[%c3_23, %c0_24] : memref<10x128xf32, #tpu.memory_space<vmem>>, vector<1x32xf32>
    %c4 = arith.constant 4 : index
    %c0_25 = arith.constant 0 : index
    %18 = vector.load %arg5[%c4, %c0_25] : memref<10x128xf32, #tpu.memory_space<vmem>>, vector<1x32xf32>
    %c5 = arith.constant 5 : index
    %c0_26 = arith.constant 0 : index
    %19 = vector.load %arg5[%c5, %c0_26] : memref<10x128xf32, #tpu.memory_space<vmem>>, vector<1x32xf32>
    %c6 = arith.constant 6 : index
    %c0_27 = arith.constant 0 : index
    %20 = vector.load %arg5[%c6, %c0_27] : memref<10x128xf32, #tpu.memory_space<vmem>>, vector<1x32xf32>
    %c7 = arith.constant 7 : index
    %c0_28 = arith.constant 0 : index
    %21 = vector.load %arg5[%c7, %c0_28] : memref<10x128xf32, #tpu.memory_space<vmem>>, vector<1x32xf32>
    %c8 = arith.constant 8 : index
    %c0_29 = arith.constant 0 : index
    %22 = vector.load %arg5[%c8, %c0_29] : memref<10x128xf32, #tpu.memory_space<vmem>>, vector<1x32xf32>
    %c9 = arith.constant 9 : index
    %c0_30 = arith.constant 0 : index
    %23 = vector.load %arg5[%c9, %c0_30] : memref<10x128xf32, #tpu.memory_space<vmem>>, vector<1x128xf32>
    %cst = arith.constant dense<0.000000e+00> : vector<16x32xf32>
    %24 = tpu.matmul %1, %7, %cst {dimension_numbers = #tpu.dot_dimension_numbers<[1], [0], [0], [1], [0, 0, 1, 1], [], []>} : vector<16x32xf32>, vector<32x32xf32>, vector<16x32xf32> -> vector<16x32xf32>
    %25 = vector.broadcast %14 : vector<1x32xf32> to vector<16x32xf32>
    %26 = arith.addf %24, %25 : vector<16x32xf32>
    %cst_31 = arith.constant dense<0.000000e+00> : vector<16x32xf32>
    %27 = tpu.matmul %3, %9, %cst_31 {dimension_numbers = #tpu.dot_dimension_numbers<[1], [0], [0], [1], [0, 0, 1, 1], [], []>} : vector<16x32xf32>, vector<32x32xf32>, vector<16x32xf32> -> vector<16x32xf32>
    %28 = vector.broadcast %15 : vector<1x32xf32> to vector<16x32xf32>
    %29 = arith.addf %27, %28 : vector<16x32xf32>
    %cst_32 = arith.constant dense<0.000000e+00> : vector<16x32xf32>
    %30 = tpu.matmul %5, %11, %cst_32 {dimension_numbers = #tpu.dot_dimension_numbers<[1], [0], [0], [1], [0, 0, 1, 1], [], []>} : vector<16x32xf32>, vector<32x32xf32>, vector<16x32xf32> -> vector<16x32xf32>
    %31 = vector.broadcast %16 : vector<1x32xf32> to vector<16x32xf32>
    %32 = arith.addf %30, %31 : vector<16x32xf32>
    %33 = vector.extract_strided_slice %26 {offsets = [0, 0], sizes = [16, 8], strides = [1, 1]} : vector<16x32xf32> to vector<16x8xf32>
    %34 = vector.extract_strided_slice %26 {offsets = [0, 8], sizes = [16, 8], strides = [1, 1]} : vector<16x32xf32> to vector<16x8xf32>
    %35 = vector.extract_strided_slice %26 {offsets = [0, 16], sizes = [16, 8], strides = [1, 1]} : vector<16x32xf32> to vector<16x8xf32>
    %36 = vector.extract_strided_slice %26 {offsets = [0, 24], sizes = [16, 8], strides = [1, 1]} : vector<16x32xf32> to vector<16x8xf32>
    %37 = tpu.concatenate %33, %34, %35, %36 in 0 : vector<16x8xf32>, vector<16x8xf32>, vector<16x8xf32>, vector<16x8xf32> -> vector<64x8xf32>
    %38 = vector.extract_strided_slice %29 {offsets = [0, 0], sizes = [16, 8], strides = [1, 1]} : vector<16x32xf32> to vector<16x8xf32>
    %39 = vector.extract_strided_slice %29 {offsets = [0, 8], sizes = [16, 8], strides = [1, 1]} : vector<16x32xf32> to vector<16x8xf32>
    %40 = vector.extract_strided_slice %29 {offsets = [0, 16], sizes = [16, 8], strides = [1, 1]} : vector<16x32xf32> to vector<16x8xf32>
    %41 = vector.extract_strided_slice %29 {offsets = [0, 24], sizes = [16, 8], strides = [1, 1]} : vector<16x32xf32> to vector<16x8xf32>
    %42 = tpu.concatenate %38, %39, %40, %41 in 0 : vector<16x8xf32>, vector<16x8xf32>, vector<16x8xf32>, vector<16x8xf32> -> vector<64x8xf32>
    %43 = vector.extract_strided_slice %32 {offsets = [0, 0], sizes = [16, 8], strides = [1, 1]} : vector<16x32xf32> to vector<16x8xf32>
    %44 = vector.extract_strided_slice %32 {offsets = [0, 8], sizes = [16, 8], strides = [1, 1]} : vector<16x32xf32> to vector<16x8xf32>
    %45 = vector.extract_strided_slice %32 {offsets = [0, 16], sizes = [16, 8], strides = [1, 1]} : vector<16x32xf32> to vector<16x8xf32>
    %46 = vector.extract_strided_slice %32 {offsets = [0, 24], sizes = [16, 8], strides = [1, 1]} : vector<16x32xf32> to vector<16x8xf32>
    %47 = tpu.concatenate %43, %44, %45, %46 in 0 : vector<16x8xf32>, vector<16x8xf32>, vector<16x8xf32>, vector<16x8xf32> -> vector<64x8xf32>
    %cst_33 = arith.constant dense<0.000000e+00> : vector<64x64xf32>
    %48 = tpu.matmul %37, %42, %cst_33 {dimension_numbers = #tpu.dot_dimension_numbers<[1], [1], [0], [0], [0, 0, 1, 0], [], []>} : vector<64x8xf32>, vector<64x8xf32>, vector<64x64xf32> -> vector<64x64xf32>
    %cst_34 = arith.constant 0.353553385 : f32
    %49 = vector.broadcast %cst_34 : f32 to vector<64x64xf32>
    %50 = arith.mulf %48, %49 : vector<64x64xf32>
    %c0_35 = arith.constant 0 : index
    %c0_36 = arith.constant 0 : index
    %51 = vector.load %arg1[%c0_35, %c0_36] : memref<64x64xf32, #tpu.memory_space<vmem>>, vector<64x64xf32>
    %52 = arith.addf %50, %51 : vector<64x64xf32>
    %cst_37 = arith.constant dense<0xFF800000> : vector<64xf32>
    %53 = vector.multi_reduction <maximumf>, %52, %cst_37 [1] : vector<64x64xf32> to vector<64xf32>
    %54 = vector.shape_cast %53 : vector<64xf32> to vector<64x1xf32>
    %55 = vector.broadcast %54 : vector<64x1xf32> to vector<64x64xf32>
    %56 = arith.subf %52, %55 : vector<64x64xf32>
    %57 = math.exp %56 : vector<64x64xf32>
    %cst_38 = arith.constant dense<0.000000e+00> : vector<64xf32>
    %58 = vector.multi_reduction <add>, %57, %cst_38 [1] : vector<64x64xf32> to vector<64xf32>
    %59 = vector.shape_cast %58 : vector<64xf32> to vector<64x1xf32>
    %cst_39 = arith.constant dense<0.000000e+00> : vector<64x8xf32>
    %60 = tpu.matmul %57, %47, %cst_39 {dimension_numbers = #tpu.dot_dimension_numbers<[1], [0], [0], [1], [0, 0, 1, 1], [], []>} : vector<64x64xf32>, vector<64x8xf32>, vector<64x8xf32> -> vector<64x8xf32>
    %61 = vector.broadcast %59 : vector<64x1xf32> to vector<64x8xf32>
    %62 = arith.divf %60, %61 : vector<64x8xf32>
    %63 = vector.extract_strided_slice %62 {offsets = [0, 0], sizes = [16, 8], strides = [1, 1]} : vector<64x8xf32> to vector<16x8xf32>
    %64 = vector.extract_strided_slice %62 {offsets = [16, 0], sizes = [16, 8], strides = [1, 1]} : vector<64x8xf32> to vector<16x8xf32>
    %65 = vector.extract_strided_slice %62 {offsets = [32, 0], sizes = [16, 8], strides = [1, 1]} : vector<64x8xf32> to vector<16x8xf32>
    %66 = vector.extract_strided_slice %62 {offsets = [48, 0], sizes = [16, 8], strides = [1, 1]} : vector<64x8xf32> to vector<16x8xf32>
    %67 = tpu.concatenate %63, %64, %65, %66 in 1 : vector<16x8xf32>, vector<16x8xf32>, vector<16x8xf32>, vector<16x8xf32> -> vector<16x32xf32>
    %cst_40 = arith.constant dense<0.000000e+00> : vector<16x32xf32>
    %68 = tpu.matmul %67, %13, %cst_40 {dimension_numbers = #tpu.dot_dimension_numbers<[1], [0], [0], [1], [0, 0, 1, 1], [], []>} : vector<16x32xf32>, vector<32x32xf32>, vector<16x32xf32> -> vector<16x32xf32>
    %69 = vector.broadcast %17 : vector<1x32xf32> to vector<16x32xf32>
    %70 = arith.addf %68, %69 : vector<16x32xf32>
    %71 = arith.addf %70, %1 : vector<16x32xf32>
    %cst_41 = arith.constant dense<0.000000e+00> : vector<16xf32>
    %72 = vector.multi_reduction <add>, %71, %cst_41 [1] : vector<16x32xf32> to vector<16xf32>
    %73 = vector.shape_cast %72 : vector<16xf32> to vector<16x1xf32>
    %cst_42 = arith.constant 3.200000e+01 : f32
    %74 = vector.broadcast %cst_42 : f32 to vector<16x1xf32>
    %75 = arith.divf %73, %74 : vector<16x1xf32>
    %76 = vector.broadcast %75 : vector<16x1xf32> to vector<16x32xf32>
    %77 = arith.subf %71, %76 : vector<16x32xf32>
    %78 = arith.mulf %77, %77 : vector<16x32xf32>
    %cst_43 = arith.constant dense<0.000000e+00> : vector<16xf32>
    %79 = vector.multi_reduction <add>, %78, %cst_43 [1] : vector<16x32xf32> to vector<16xf32>
    %80 = vector.shape_cast %79 : vector<16xf32> to vector<16x1xf32>
    %cst_44 = arith.constant 3.200000e+01 : f32
    %81 = vector.broadcast %cst_44 : f32 to vector<16x1xf32>
    %82 = arith.divf %80, %81 : vector<16x1xf32>
    %83 = vector.broadcast %75 : vector<16x1xf32> to vector<16x32xf32>
    %84 = arith.subf %71, %83 : vector<16x32xf32>
    %cst_45 = arith.constant 9.99999974E-6 : f32
    %85 = vector.broadcast %cst_45 : f32 to vector<16x1xf32>
    %86 = arith.addf %82, %85 : vector<16x1xf32>
    %87 = math.rsqrt %86 : vector<16x1xf32>
    %88 = vector.broadcast %87 : vector<16x1xf32> to vector<16x32xf32>
    %89 = arith.mulf %84, %88 : vector<16x32xf32>
    %90 = vector.broadcast %18 : vector<1x32xf32> to vector<16x32xf32>
    %91 = arith.mulf %89, %90 : vector<16x32xf32>
    %92 = vector.broadcast %19 : vector<1x32xf32> to vector<16x32xf32>
    %93 = arith.addf %91, %92 : vector<16x32xf32>
    %c0_46 = arith.constant 0 : index
    %c0_47 = arith.constant 0 : index
    %94 = vector.load %arg3[%c0_46, %c0_47] : memref<32x128xf32, #tpu.memory_space<vmem>>, vector<32x128xf32>
    %cst_48 = arith.constant dense<0.000000e+00> : vector<16x128xf32>
    %95 = tpu.matmul %93, %94, %cst_48 {dimension_numbers = #tpu.dot_dimension_numbers<[1], [0], [0], [1], [0, 0, 1, 1], [], []>} : vector<16x32xf32>, vector<32x128xf32>, vector<16x128xf32> -> vector<16x128xf32>
    %96 = vector.broadcast %23 : vector<1x128xf32> to vector<16x128xf32>
    %97 = arith.addf %95, %96 : vector<16x128xf32>
    %cst_49 = arith.constant 0.000000e+00 : f32
    %98 = vector.broadcast %cst_49 : f32 to vector<16x128xf32>
    %99 = arith.maximumf %97, %98 : vector<16x128xf32>
    %c0_50 = arith.constant 0 : index
    %c0_51 = arith.constant 0 : index
    %100 = vector.load %arg4[%c0_50, %c0_51] : memref<128x32xf32, #tpu.memory_space<vmem>>, vector<128x32xf32>
    %cst_52 = arith.constant dense<0.000000e+00> : vector<16x32xf32>
    %101 = tpu.matmul %99, %100, %cst_52 {dimension_numbers = #tpu.dot_dimension_numbers<[1], [0], [0], [1], [0, 0, 1, 1], [], []>} : vector<16x128xf32>, vector<128x32xf32>, vector<16x32xf32> -> vector<16x32xf32>
    %102 = vector.broadcast %22 : vector<1x32xf32> to vector<16x32xf32>
    %103 = arith.addf %101, %102 : vector<16x32xf32>
    %104 = arith.addf %103, %93 : vector<16x32xf32>
    %cst_53 = arith.constant dense<0.000000e+00> : vector<16xf32>
    %105 = vector.multi_reduction <add>, %104, %cst_53 [1] : vector<16x32xf32> to vector<16xf32>
    %106 = vector.shape_cast %105 : vector<16xf32> to vector<16x1xf32>
    %cst_54 = arith.constant 3.200000e+01 : f32
    %107 = vector.broadcast %cst_54 : f32 to vector<16x1xf32>
    %108 = arith.divf %106, %107 : vector<16x1xf32>
    %109 = vector.broadcast %108 : vector<16x1xf32> to vector<16x32xf32>
    %110 = arith.subf %104, %109 : vector<16x32xf32>
    %111 = arith.mulf %110, %110 : vector<16x32xf32>
    %cst_55 = arith.constant dense<0.000000e+00> : vector<16xf32>
    %112 = vector.multi_reduction <add>, %111, %cst_55 [1] : vector<16x32xf32> to vector<16xf32>
    %113 = vector.shape_cast %112 : vector<16xf32> to vector<16x1xf32>
    %cst_56 = arith.constant 3.200000e+01 : f32
    %114 = vector.broadcast %cst_56 : f32 to vector<16x1xf32>
    %115 = arith.divf %113, %114 : vector<16x1xf32>
    %116 = vector.broadcast %108 : vector<16x1xf32> to vector<16x32xf32>
    %117 = arith.subf %104, %116 : vector<16x32xf32>
    %cst_57 = arith.constant 9.99999974E-6 : f32
    %118 = vector.broadcast %cst_57 : f32 to vector<16x1xf32>
    %119 = arith.addf %115, %118 : vector<16x1xf32>
    %120 = math.rsqrt %119 : vector<16x1xf32>
    %121 = vector.broadcast %120 : vector<16x1xf32> to vector<16x32xf32>
    %122 = arith.mulf %117, %121 : vector<16x32xf32>
    %123 = vector.broadcast %20 : vector<1x32xf32> to vector<16x32xf32>
    %124 = arith.mulf %122, %123 : vector<16x32xf32>
    %125 = vector.broadcast %21 : vector<1x32xf32> to vector<16x32xf32>
    %126 = arith.addf %124, %125 : vector<16x32xf32>
    %c0_58 = arith.constant 0 : index
    %c0_59 = arith.constant 0 : index
    %127 = vector.load %arg6[%c0_58, %c0_59] : memref<16x32xf32, #tpu.memory_space<vmem>>, vector<16x32xf32>
    tpu.vector_store %arg6[%c0_58, %c0_59], %126 {strides = array<i32>} : memref<16x32xf32, #tpu.memory_space<vmem>>, vector<16x32xf32>,
    return
  }
}

</mosaic_0001>

<bundles_post_ra>
// kernel: tpu_custom_call.1
= control target key start
LH: loop header
LB: loop body
LE: loop exit
PB: predicated region body
PF: predicated region fallthrough
CT: control target
= control target key end

     0   :  { %11 = vsyncpa [#allocation3], 0  ;;  %s1897_s0 = inlined_call_operand.hbm [shape: f32[3,16,32], index: 0, kind: input, shape index: {}]   ;;  %s1898_s1 = inlined_call_operand.hbm [shape: f32[64,64], index: 1, kind: input, shape index: {}]   ;;  %s1899_s2 = inlined_call_operand.vmem [shape: f32[4,32,32], index: 2, kind: input, shape index: {}]   ;;  %s1900_s3 = inlined_call_operand.vmem [shape: f32[32,128], index: 3, kind: input, shape index: {}]   ;;  %s1901_s4 = inlined_call_operand.vmem [shape: f32[128,32], index: 4, kind: input, shape index: {}]   ;;  %s1902_s5 = inlined_call_operand.hbm [shape: f32[10,128], index: 5, kind: input, shape index: {}]   ;;  %s1903_s6 = inlined_call_operand.hbm [shape: f32[16,32], index: 6, kind: output, shape index: {}]  }
   0x1   :  { %12 = vsyncpa [#allocation6], 0 }
   0x2   :  { %13 = vsyncpa [#allocation4], 0  ;;  %s1609_s21 = smov [#allocation5]   ;;  %s1610_s23 = smov [#allocation2]  }
   0x3   :  { %s31_s22 = sshll.u32 %s1609_s21, 4  ;;  %s19_s24 = sshll.u32 %s1610_s23, 4  ;;  %s32_s22 = int_to_ptr.vmem [resolvable:$true] %s31_s22  ;;  %s20_s24 = int_to_ptr.vmem [resolvable:$true] %s19_s24 }
   0x4   :  { %s1531_s25 = scalar_lea.vmem %s32_s22, 1024  ;;  %p1536_p1 = scmp.lt.s32.totalorder %s32_s22, %s32_s22 }
   0x5   :  { %p1532_p0 = scmp.ne.s32.totalorder %s32_s22, %s1531_s25  ;;  %p1537_p2 = scmp.lt.s32.totalorder %s1531_s25, %s1531_s25 }
   0x7   :  { %p1538_p3 = por %p1537_p2, %p1536_p1 }
   0x9   :  { %p1539_p4 = pnand %p1538_p3, %p1532_p0 }
   0xb   :  { %1542 = shalt.err (!%p1539_p4)
}
   0xc   :  { %s1611_s26 = smov 128   ;;  %s1612_s27 = smov 8  }
   0xd   :  { %37 = dma.hbm_to_vmem [thread:$0]  %s1898_s1, 1024, %s32_s22, [#allocation6], %s1611_s26, %s1611_s26, %s1612_s27  }
   0xe   :  { %s1551_s30 = scalar_lea.vmem %s20_s24, 768  ;;  %p1556_p6 = scmp.lt.s32.totalorder %s20_s24, %s20_s24 }
   0xf   :  { %p1552_p5 = scmp.ne.s32.totalorder %s20_s24, %s1551_s30  ;;  %p1557_p7 = scmp.lt.s32.totalorder %s1551_s30, %s1551_s30 }
  0x11   :  { %p1558_p8 = por %p1557_p7, %p1556_p6 }
  0x13   :  { %p1559_p9 = pnand %p1558_p8, %p1552_p5 }
  0x15   :  { %1562 = shalt.err (!%p1559_p9)
}
  0x16   :  { %25 = dma.hbm_to_vmem [thread:$0]  %s1897_s0, 768, %s20_s24, [#allocation3], %s1611_s26, %s1611_s26, %s1612_s27  }
  0x17   :  { %s1613_s9 = smov [#allocation7]  }
  0x18   :  { %s49_s10 = sshll.u32 %s1613_s9, 4  ;;  %s50_s10 = int_to_ptr.vmem [resolvable:$true] %s49_s10 }
  0x19   :  { %s1571_s11 = scalar_lea.vmem %s50_s10, 256  ;;  %p1576_p11 = scmp.lt.s32.totalorder %s50_s10, %s50_s10 }
  0x1a   :  { %p1572_p10 = scmp.ne.s32.totalorder %s50_s10, %s1571_s11  ;;  %p1577_p12 = scmp.lt.s32.totalorder %s1571_s11, %s1571_s11 }
  0x1c   :  { %p1578_p13 = por %p1577_p12, %p1576_p11 }
  0x1e   :  { %p1579_p0 = pnand %p1578_p13, %p1572_p10 }
  0x20   :  { %1582 = shalt.err (!%p1579_p0)
}
  0x21   :  { %55 = dma.hbm_to_vmem [thread:$0]  %s1902_s5, 256, %s50_s10, [#allocation6], %s1611_s26, %s1611_s26, %s1612_s27  }
  0x22   :  { %1603 = dma.done.wait [#allocation3], 768  }
  0x23   :  { %1604 = vsyncadd [#allocation3], 4294966528 }
  0x24   :  { %1605 = dma.done.wait [#allocation6], 1280  }
  0x25   :  { %1606 = vsyncadd [#allocation6], 4294966016  ;;  %vm106_vm0 = vcmask 261120   ;;  %v76_v0 = vld [vmem:[%s1899_s2 + $0x18] sm:$0xff]  ;;  %v75_v1 = vld [vmem:[%s1899_s2 + $0x10] sm:$0xff]  ;;  %vm406_vm1 = vcmask 64512  }
  0x26   :  { %1326 = vmatprep.subr.mxu0 %v76_v0  ;;  %v1679_v2 = vld [vmem:[#allocation2] sm:$0xff]  ;;  %v74_v3 = vld [vmem:[%s1899_s2 + $0x8] sm:$0xff]  ;;  %v1193_v6 = vld [vmem:[%s1899_s2 + $0x38] sm:$0xff]  ;;  %s1614_s12 = smov 112   ;;  %s1615_s0 = smov 104   ;;  %vm568_vm2 = vcmask 523264  }
  0x27   :  { %1327 = vmatpush3.msra.mxu0 %v76_v0  ;;  %1334 = vmatprep.mubr.msk.f32.mxu0 %vm106_vm0, %v1679_v2  ;;  %v73_v4 = vld [vmem:[%s1899_s2] sm:$0xff]  ;;  %v1689_v5 = vld [vmem:[#allocation2 + $0x8] sm:$0xff]  ;;  %v68_v7 = vld [vmem:[#allocation2 + $0x10] sm:$0xff]  ;;  %s1616_s13 = smov 120   ;;  %s1617_s21 = smov 16   ;;  %vm815_vm3 = vcmask 195584  }
  0x28   :  { %1328 = vmatprep.subr.mxu0 %v75_v1  ;;  %v1192_v8 = vld [vmem:[%s1899_s2 + $0x30] sm:$0xff]  ;;  %v1191_v9 = vld [vmem:[%s1899_s2 + $0x28] sm:$0xff]  ;;  %v1190_v10 = vld [vmem:[%s1899_s2 + $0x20] sm:$0xff]  ;;  %vm812_vm4 = vcmask 130048  }
  0x29   :  { %1329 = vmatpush3.msra.mxu0 %v75_v1  ;;  %v69_v11 = vld [vmem:[#allocation2 + $0x18] sm:$0xff]  ;;  %v1196_v13 = vld [vmem:[%s1899_s2 + $0x50] sm:$0xff]  ;;  %v71_v14 = vld [vmem:[#allocation2 + $0x20] sm:$0xff] }
  0x2a   :  { %1330 = vmatprep.subr.mxu0 %v74_v3  ;;  %v1197_v12 = vld [vmem:[%s1899_s2 + $0x58] sm:$0xff]  ;;  %v1195_v15 = vld [vmem:[%s1899_s2 + $0x48] sm:$0xff]  ;;  %v1194_v16 = vld [vmem:[%s1899_s2 + $0x40] sm:$0xff] }
  0x2b   :  { %1331 = vmatpush3.msra.mxu0 %v74_v3  ;;  %v72_v17 = vld [vmem:[#allocation2 + $0x28] sm:$0xff]  ;;  %v1202_v19 = vld [vmem:[#allocation7] ss:$0 sm:$0xff]  ;;  %v1205_v22 = vld [vmem:[#allocation7 + $0x1] ss:$0 sm:$0xff] }
  0x2c   :  { %1332 = vmatprep.subr.mxu0 %v73_v4  ;;  %v1208_v28 = vld [vmem:[#allocation7 + $0x2] ss:$0 sm:$0xff]  ;;  %v553_v50 = vld [vmem:[#allocation5 + $0x8] sm:$0xff]  ;;  %v555_v57 = vld [vmem:[#allocation5 + $0x18] sm:$0xff] }
  0x2d   :  { %1333 = vmatpush3.msra.mxu0 %v73_v4  ;;  %v552_v53 = vld [vmem:[#allocation5] sm:$0xff]  ;;  %v554_v1 = vld [vmem:[#allocation5 + $0x10] sm:$0xff] }
  0x2e   :  { %1335 = vmatmul.mubr.msk.f32.vlgmr.msra.gmra.mxu0 %vm106_vm0, %v1689_v5  ;;  %1337 = vmatprep.subr.mxu0 %v1193_v6 }
  0x2f   :  { %1338 = vmatpush3.msra.mxu0 %v1193_v6  ;;  %1345 = vmatprep.mubr.msk.f32.mxu0 %vm106_vm0, %v68_v7  ;;  %v556_v7 = vld [vmem:[#allocation5 + $0x20] sm:$0xff] }
  0x30   :  { %1339 = vmatprep.subr.mxu0 %v1192_v8 }
  0x31   :  { %1340 = vmatpush3.msra.mxu0 %v1192_v8 }
  0x32   :  { %1341 = vmatprep.subr.mxu0 %v1191_v9 }
  0x33   :  { %1342 = vmatpush3.msra.mxu0 %v1191_v9 }
  0x34   :  { %1343 = vmatprep.subr.mxu0 %v1190_v10 }
  0x35   :  { %1344 = vmatpush3.msra.mxu0 %v1190_v10 }
  0x36   :  { %1346 = vmatmul.mubr.msk.f32.vlgmr.msra.gmra.mxu0 %vm106_vm0, %v69_v11  ;;  %1348 = vmatprep.subr.mxu0 %v1197_v12 }
  0x37   :  { %1349 = vmatpush3.msra.mxu0 %v1197_v12  ;;  %1356 = vmatprep.mubr.msk.f32.mxu0 %vm106_vm0, %v71_v14  ;;  %v557_v12 = vld [vmem:[#allocation5 + $0x28] sm:$0xff] }
  0x38   :  { %1350 = vmatprep.subr.mxu0 %v1196_v13 }
  0x39   :  { %1351 = vmatpush3.msra.mxu0 %v1196_v13 }
  0x3a   :  { %1352 = vmatprep.subr.mxu0 %v1195_v15 }
  0x3b   :  { %1353 = vmatpush3.msra.mxu0 %v1195_v15 }
  0x3c   :  { %1354 = vmatprep.subr.mxu0 %v1194_v16 }
  0x3d   :  { %1355 = vmatpush3.msra.mxu0 %v1194_v16  ;;  %v558_v16 = vld [vmem:[#allocation5 + $0x30] sm:$0xff] }
  0x3e   :  { %1357 = vmatmul.mubr.msk.f32.vlgmr.msra.gmra.mxu0 %vm106_vm0, %v72_v17 }
  0xee   :  { %v1336_v18 = vpop.f32.mrf.mxu0 }
  0xef   :  { %v185_v27 = vadd.f32 %v1336_v18, %v1202_v19 }
  0xf0   :  { %v179_v20 = vpop.f32.mrf.mxu0 }
  0xf1   :  { %v180_v21 = vadd.f32 %v1202_v19, %v179_v20 }
  0xf3   :  { %1375 = vmatprep.mubr.msk.f32.mxu1 %vm406_vm1, %v180_v21 }
  0xf6   :  { %v1347_v23 = vpop.f32.mrf.mxu0 }
  0xf7   :  { %v270_v24 = vadd.f32 %v1347_v23, %v1205_v22 }
  0xf8   :  { %v264_v25 = vpop.f32.mrf.mxu0 }
  0xf9   :  { %380 = vrot.lane.b32.xlu1 %v270_v24, %s1614_s12  ;;  %384 = vrot.lane.b32.xlu0 %v270_v24, %s1615_s0  ;;  %v265_v26 = vadd.f32 %v1205_v22, %v264_v25 }
  0xfd   :  { %378 = vrot.lane.b32.xlu1 %v265_v26, %s1614_s12  ;;  %382 = vrot.lane.b32.xlu0 %v265_v26, %s1615_s0 }
  0xfe   :  { %v1358_v29 = vpop.f32.mrf.mxu0 }
  0xff   :  { %v1726_v30 = vadd.f32 %v1358_v29, %v1208_v28 }
 0x100   :  { %v349_v31 = vpop.f32.mrf.mxu0 }
 0x101   :  { %374 = vrot.lane.b32.xlu1 %v265_v26, %s1616_s13  ;;  %376 = vrot.lane.b32.xlu0 %v270_v24, %s1616_s13  ;;  %v1729_v32 = vadd.f32 %v1208_v28, %v349_v31 }
 0x105   :  { %362 = vrot.lane.b32.xlu1 %v185_v27, %s1616_s13  ;;  %360 = vrot.lane.b32.xlu0 %v180_v21, %s1616_s13 }
 0x109   :  { %366 = vrot.lane.b32.xlu1 %v185_v27, %s1614_s12  ;;  %364 = vrot.lane.b32.xlu0 %v180_v21, %s1614_s12 }
 0x10d   :  { %370 = vrot.lane.b32.xlu1 %v185_v27, %s1615_s0  ;;  %368 = vrot.lane.b32.xlu0 %v180_v21, %s1615_s0  ;;  %v559_v21 = vld [vmem:[#allocation5 + $0x38] sm:$0xff] }
 0x111   :  { %402 = vrot.lane.b32.xlu1 %v1726_v30, %s1615_s0  ;;  %400 = vrot.lane.b32.xlu0 %v1729_v32, %s1615_s0 }
 0x115   :  { %396 = vrot.lane.b32.xlu1 %v1726_v30, %s1614_s12 }
 0x119   :  { %394 = vrot.lane.b32.xlu1 %v1729_v32, %s1614_s12 }
 0x16b   :  { %v385_v33 = vpop.permute.xlu0 %384  ;;  %v381_v34 = vpop.permute.xlu1 %380 }
 0x16c   :  { %1359 = vmatprep.subr.msk.mxu1 %vm406_vm1, %v385_v33 }
 0x16d   :  { %1360 = vmatpush3.xpose.msk.msra.mxu1 %vm406_vm1, %v385_v33 }
 0x16f   :  { %v383_v35 = vpop.permute.xlu0 %382  ;;  %v379_v36 = vpop.permute.xlu1 %378 }
 0x170   :  { %1361 = vmatprep.subr.msk.mxu1 %vm406_vm1, %v383_v35 }
 0x171   :  { %1362 = vmatpush3.xpose.msk.msra.mxu1 %vm406_vm1, %v383_v35 }
 0x172   :  { %1363 = vmatprep.subr.msk.mxu1 %vm406_vm1, %v381_v34 }
 0x173   :  { %v377_v37 = vpop.permute.xlu0 %376  ;;  %v375_v38 = vpop.permute.xlu1 %374 }
 0x175   :  { %1364 = vmatpush3.xpose.msk.msra.mxu1 %vm406_vm1, %v381_v34 }
 0x176   :  { %1365 = vmatprep.subr.msk.mxu1 %vm406_vm1, %v379_v36 }
 0x177   :  { %v361_v39 = vpop.permute.xlu0 %360  ;;  %v363_v40 = vpop.permute.xlu1 %362 }
 0x179   :  { %1366 = vmatpush3.xpose.msk.msra.mxu1 %vm406_vm1, %v379_v36 }
 0x17a   :  { %1367 = vmatprep.subr.msk.mxu1 %vm406_vm1, %v377_v37 }
 0x17b   :  { %v365_v41 = vpop.permute.xlu0 %364  ;;  %v367_v42 = vpop.permute.xlu1 %366 }
 0x17d   :  { %1368 = vmatpush3.xpose.msk.msra.mxu1 %vm406_vm1, %v377_v37 }
 0x17e   :  { %1369 = vmatprep.subr.msk.mxu1 %vm406_vm1, %v375_v38 }
 0x17f   :  { %v369_v43 = vpop.permute.xlu0 %368  ;;  %v371_v44 = vpop.permute.xlu1 %370 }
 0x181   :  { %1370 = vmatpush3.xpose.msk.msra.mxu1 %vm406_vm1, %v375_v38 }
 0x182   :  { %1371 = vmatprep.subr.msk.mxu1 %vm406_vm1, %v270_v24 }
 0x183   :  { %v403_v45 = vpop.permute.xlu1 %402  ;;  %v401_v46 = vpop.permute.xlu0 %400 }
 0x184   :  { %1387 = vmatprep.subr.mxu0 %v403_v45 }
 0x185   :  { %1372 = vmatpush3.xpose.msk.msra.mxu1 %vm406_vm1, %v270_v24  ;;  %1388 = vmatpush3.msra.mxu0 %v403_v45 }
 0x186   :  { %1373 = vmatprep.subr.msk.mxu1 %vm406_vm1, %v265_v26  ;;  %1389 = vmatprep.subr.mxu0 %v401_v46 }
 0x187   :  { %v397_v47 = vpop.permute.xlu1 %396  ;;  %1390 = vmatpush3.msra.mxu0 %v401_v46 }
 0x188   :  { %1391 = vmatprep.subr.mxu0 %v397_v47 }
 0x189   :  { %1374 = vmatpush3.xpose.msk.msra.mxu1 %vm406_vm1, %v265_v26  ;;  %1392 = vmatpush3.msra.mxu0 %v397_v47 }
 0x18b   :  { %v395_v48 = vpop.permute.xlu1 %394 }
 0x18c   :  { %1376 = vmatmul.mubr.msk.f32.vlgmr.msra.gmra.mxu1 %vm406_vm1, %v185_v27  ;;  %1393 = vmatprep.subr.mxu0 %v395_v48 }
 0x18d   :  { %1378 = vmatprep.mubr.msk.f32.mxu1 %vm406_vm1, %v361_v39  ;;  %1394 = vmatpush3.msra.mxu0 %v395_v48 }
 0x190   :  { %1379 = vmatmul.mubr.msk.f32.gmra.mxu1 %vm406_vm1, %v363_v40 }
 0x191   :  { %1381 = vmatprep.mubr.msk.f32.mxu1 %vm406_vm1, %v365_v41 }
 0x194   :  { %1382 = vmatmul.mubr.msk.f32.gmra.mxu1 %vm406_vm1, %v367_v42 }
 0x195   :  { %1384 = vmatprep.mubr.msk.f32.mxu1 %vm406_vm1, %v369_v43 }
 0x198   :  { %1385 = vmatmul.mubr.msk.f32.gmra.mxu1 %vm406_vm1, %v371_v44 }
 0x24c   :  { %v1377_v49 = vpop.f32.mrf.mxu1 }
 0x24d   :  { %v545_v51 = vmul.f32 0.35355338, %v1377_v49 }
 0x24e   :  { %v505_v52 = vpop.f32.mrf.mxu1 }
 0x24f   :  { %v544_v54 = vmul.f32 0.35355338, %v505_v52  ;;  %v561_v55 = vadd.f32 %v553_v50, %v545_v51 }
 0x250   :  { %v1380_v56 = vpop.f32.mrf.mxu1 }
 0x251   :  { %v547_v58 = vmul.f32 0.35355338, %v1380_v56  ;;  %v572_v59 = vsel %vm568_vm2, %v561_v55, -inf  ;;  %v560_v60 = vadd.f32 %v552_v53, %v544_v54 }
 0x252   :  { %573 = vmax.xlane.f32.xlu1 %v572_v59  ;;  %v515_v61 = vpop.f32.mrf.mxu1 }
 0x253   :  { %v546_v62 = vmul.f32 0.35355338, %v515_v61  ;;  %v569_v63 = vsel %vm568_vm2, %v560_v60, -inf  ;;  %v563_v0 = vadd.f32 %v555_v57, %v547_v58 }
 0x254   :  { %570 = vmax.xlane.f32.xlu0 %v569_v63  ;;  %v1383_v3 = vpop.f32.mrf.mxu1 }
 0x255   :  { %v562_v6 = vadd.f32 %v554_v1, %v546_v62  ;;  %v549_v8 = vmul.f32 0.35355338, %v1383_v3  ;;  %v578_v10 = vsel %vm568_vm2, %v563_v0, -inf }
 0x256   :  { %v525_v4 = vpop.f32.mrf.mxu1 }
 0x257   :  { %v548_v9 = vmul.f32 0.35355338, %v525_v4  ;;  %v575_v15 = vsel %vm568_vm2, %v562_v6, -inf  ;;  %v565_v20 = vadd.f32 %v557_v12, %v549_v8  ;;  %v1200_v12 = vld [vmem:[%s1899_s2 + $0x70] sm:$0xff] }
 0x258   :  { %579 = vmax.xlane.f32.xlu0 %v578_v10  ;;  %v1386_v11 = vpop.f32.mrf.mxu1 }
 0x259   :  { %v564_v13 = vadd.f32 %v556_v7, %v548_v9  ;;  %v551_v17 = vmul.f32 0.35355338, %v1386_v11  ;;  %v584_v23 = vsel %vm568_vm2, %v565_v20, -inf  ;;  %v1201_v7 = vld [vmem:[%s1899_s2 + $0x78] sm:$0xff] }
 0x25a   :  { %v535_v14 = vpop.f32.mrf.mxu1 }
 0x25b   :  { %v550_v18 = vmul.f32 0.35355338, %v535_v14  ;;  %v581_v19 = vsel %vm568_vm2, %v564_v13, -inf  ;;  %v567_v25 = vadd.f32 %v559_v21, %v551_v17 }
 0x25c   :  { %576 = vmax.xlane.f32.xlu0 %v575_v15  ;;  %582 = vmax.xlane.f32.xlu1 %v581_v19  ;;  %v1199_v15 = vld [vmem:[%s1899_s2 + $0x68] sm:$0xff] }
 0x25d   :  { %v566_v22 = vadd.f32 %v558_v16, %v550_v18  ;;  %v590_v26 = vsel %vm568_vm2, %v567_v25, -inf }
 0x25f   :  { %v587_v24 = vsel %vm568_vm2, %v566_v22, -inf }
 0x260   :  { %585 = vmax.xlane.f32.xlu0 %v584_v23  ;;  %588 = vmax.xlane.f32.xlu1 %v587_v24 }
 0x264   :  { %591 = vmax.xlane.f32.xlu0 %v590_v26 }
 0x271   :  { %388 = vrot.lane.b32.xlu1 %v1729_v32, %s1616_s13 }
 0x27a   :  { %390 = vrot.lane.b32.xlu0 %v1726_v30, %s1616_s13 }
 0x2db   :  { %v574_v31 = vpop.xlane.xlu1 %573 }
 0x2dc   :  { %v594_v35 = vsub.f32 %v561_v55, %v574_v31 }
 0x2dd   :  { %v571_v27 = vpop.xlane.xlu0 %570 }
 0x2de   :  { %v593_v28 = vsub.f32 %v560_v60, %v571_v27  ;;  %v603_v40 = vmul.f32 1.442695, %v594_v35 }
 0x2e0   :  { %v601_v29 = vmul.f32 1.442695, %v593_v28 }
 0x2e1   :  { %v580_v33 = vpop.xlane.xlu0 %579 }
 0x2e2   :  { %1483 = vpow2.f32 %v601_v29  ;;  %v596_v34 = vsub.f32 %v563_v0, %v580_v33 }
 0x2e4   :  { %v607_v36 = vmul.f32 1.442695, %v596_v34 }
 0x2e5   :  { %v577_v37 = vpop.xlane.xlu0 %576  ;;  %v583_v38 = vpop.xlane.xlu1 %582 }
 0x2e6   :  { %1485 = vpow2.f32 %v607_v36  ;;  %v595_v39 = vsub.f32 %v562_v6, %v577_v37  ;;  %v597_v42 = vsub.f32 %v564_v13, %v583_v38 }
 0x2e8   :  { %v605_v41 = vmul.f32 1.442695, %v595_v39  ;;  %v609_v47 = vmul.f32 1.442695, %v597_v42 }
 0x2e9   :  { %v586_v43 = vpop.xlane.xlu0 %585  ;;  %v589_v44 = vpop.xlane.xlu1 %588 }
 0x2ea   :  { %1487 = vpow2.f32 %v605_v41  ;;  %v598_v45 = vsub.f32 %v565_v20, %v586_v43  ;;  %v599_v46 = vsub.f32 %v566_v22, %v589_v44  ;;  %v1198_v20 = vld [vmem:[%s1899_s2 + $0x60] sm:$0xff]  ;;  %s1618_s2 = smov 24  }
 0x2eb   :  { %1489 = vpow2.f32 %v603_v40 }
 0x2ec   :  { %v611_v48 = vmul.f32 1.442695, %v598_v45  ;;  %v613_v49 = vmul.f32 1.442695, %v599_v46 }
 0x2ed   :  { %v592_v50 = vpop.xlane.xlu0 %591  ;;  %v389_v56 = vpop.permute.xlu1 %388 }
 0x2ee   :  { %1491 = vpow2.f32 %v611_v48  ;;  %v600_v51 = vsub.f32 %v567_v25, %v592_v50 }
 0x2ef   :  { %v1484_v52 = vpop.eup %1483  ;;  %1493 = vpow2.f32 %v613_v49 }
 0x2f0   :  { %1495 = vpow2.f32 %v609_v47  ;;  %v615_v53 = vmul.f32 1.442695, %v600_v51  ;;  %1403 = vmatprep.mubr.msk.f32.mxu0 %vm568_vm2, %v1484_v52  ;;  %v617_v3 = vsel %vm568_vm2, %v1484_v52, 0.0 }
 0x2f1   :  { %v391_v54 = vpop.permute.xlu0 %390 }
 0x2f2   :  { %1395 = vmatprep.subr.mxu0 %v391_v54  ;;  %1497 = vpow2.f32 %v615_v53 }
 0x2f3   :  { %v1486_v55 = vpop.eup %1485  ;;  %1396 = vmatpush3.msra.mxu0 %v391_v54 }
 0x2f4   :  { %1397 = vmatprep.subr.mxu0 %v389_v56  ;;  %v626_v57 = vsel %vm568_vm2, %v1486_v55, 0.0 }
 0x2f5   :  { %627 = vadd.xlane.f32.xlu1 %v626_v57  ;;  %1398 = vmatpush3.msra.mxu0 %v389_v56  ;;  %v1235_v57 = vld [vmem:[#allocation7 + $0x3] ss:$0 sm:$0xff] }
 0x2f6   :  { %1399 = vmatprep.subr.mxu0 %v1726_v30 }
 0x2f7   :  { %v1488_v58 = vpop.eup %1487  ;;  %1400 = vmatpush3.msra.mxu0 %v1726_v30 }
 0x2f8   :  { %1401 = vmatprep.subr.mxu0 %v1729_v32  ;;  %v623_v59 = vsel %vm568_vm2, %v1488_v58, 0.0  ;;  %v1490_v60 = vpop.eup %1489 }
 0x2f9   :  { %624 = vadd.xlane.f32.xlu0 %v623_v59  ;;  %1402 = vmatpush3.msra.mxu0 %v1729_v32  ;;  %v620_v6 = vsel %vm568_vm2, %v1490_v60, 0.0 }
 0x2fa   :  { %1404 = vmatmul.mubr.msk.f32.vlgmr.msra.gmra.mxu0 %vm568_vm2, %v1490_v60  ;;  %1415 = vmatprep.subr.mxu0 %v1201_v7 }
 0x2fb   :  { %v1492_v61 = vpop.eup %1491  ;;  %1406 = vmatprep.mubr.msk.f32.mxu0 %vm568_vm2, %v1488_v58  ;;  %1416 = vmatpush3.msra.mxu0 %v1201_v7 }
 0x2fc   :  { %v1494_v62 = vpop.eup %1493  ;;  %v632_v63 = vsel %vm568_vm2, %v1492_v61, 0.0  ;;  %1417 = vmatprep.subr.mxu0 %v1200_v12 }
 0x2fd   :  { %v1496_v0 = vpop.eup %1495  ;;  %633 = vadd.xlane.f32.xlu0 %v632_v63  ;;  %v635_v30 = vsel %vm568_vm2, %v1494_v62, 0.0  ;;  %1418 = vmatpush3.msra.mxu0 %v1200_v12  ;;  %v945_v12 = vld [vmem:[%s1900_s3 + $0x8] sm:$0xff] }
 0x2fe   :  { %636 = vadd.xlane.f32.xlu1 %v635_v30  ;;  %1407 = vmatmul.mubr.msk.f32.gmra.mxu0 %vm568_vm2, %v1486_v55  ;;  %v629_v1 = vsel %vm568_vm2, %v1496_v0, 0.0 }
 0x2ff   :  { %1409 = vmatprep.mubr.msk.f32.mxu0 %vm568_vm2, %v1496_v0  ;;  %v1498_v32 = vpop.eup %1497  ;;  %1419 = vmatprep.subr.mxu0 %v1199_v15 }
 0x300   :  { %v638_v4 = vsel %vm568_vm2, %v1498_v32, 0.0  ;;  %1420 = vmatpush3.msra.mxu0 %v1199_v15  ;;  %v1049_v15 = vld [vmem:[%s1901_s4 + $0x70] sm:$0xff] }
 0x301   :  { %630 = vadd.xlane.f32.xlu0 %v629_v1  ;;  %1421 = vmatprep.subr.mxu0 %v1198_v20 }
 0x302   :  { %618 = vadd.xlane.f32.xlu1 %v617_v3  ;;  %1410 = vmatmul.mubr.msk.f32.gmra.mxu0 %vm568_vm2, %v1492_v61 }
 0x303   :  { %1412 = vmatprep.mubr.msk.f32.mxu0 %vm568_vm2, %v1494_v62  ;;  %1422 = vmatpush3.msra.mxu0 %v1198_v20  ;;  %v1044_v20 = vld [vmem:[%s1901_s4 + $0x48] sm:$0xff] }
 0x305   :  { %639 = vadd.xlane.f32.xlu0 %v638_v4 }
 0x306   :  { %1413 = vmatmul.mubr.msk.f32.gmra.mxu0 %vm568_vm2, %v1498_v32 }
 0x309   :  { %621 = vadd.xlane.f32.xlu0 %v620_v6 }
 0x37e   :  { %v628_v9 = vpop.xlane.xlu1 %627 }
 0x37f   :  { %1499 = vrcp.f32 %v628_v9 }
 0x382   :  { %v625_v8 = vpop.xlane.xlu0 %624 }
 0x383   :  { %1501 = vrcp.f32 %v625_v8 }
 0x386   :  { %v634_v10 = vpop.xlane.xlu0 %633 }
 0x387   :  { %1503 = vrcp.f32 %v634_v10  ;;  %v637_v13 = vpop.xlane.xlu1 %636  ;;  %v947_v10 = vld [vmem:[%s1900_s3 + $0x18] sm:$0xff] }
 0x388   :  { %1505 = vrcp.f32 %v637_v13  ;;  %1426 = vmatprep.subr.mxu0 %v947_v10  ;;  %v944_v13 = vld [vmem:[%s1900_s3] sm:$0xff] }
 0x38a   :  { %v631_v11 = vpop.xlane.xlu0 %630 }
 0x38b   :  { %1507 = vrcp.f32 %v631_v11  ;;  %v619_v39 = vpop.xlane.xlu1 %618  ;;  %v946_v11 = vld [vmem:[%s1900_s3 + $0x10] sm:$0xff] }
 0x38c   :  { %v1500_v18 = vpop.eup %1499 }
 0x38e   :  { %v640_v16 = vpop.xlane.xlu0 %639 }
 0x38f   :  { %1509 = vrcp.f32 %v640_v16  ;;  %v1048_v16 = vld [vmem:[%s1901_s4 + $0x68] sm:$0xff] }
 0x390   :  { %v1502_v22 = vpop.eup %1501  ;;  %1511 = vrcp.f32 %v619_v39 }
 0x392   :  { %v622_v40 = vpop.xlane.xlu0 %621 }
 0x393   :  { %1513 = vrcp.f32 %v622_v40 }
 0x394   :  { %v1504_v26 = vpop.eup %1503 }
 0x395   :  { %v1506_v31 = vpop.eup %1505 }
 0x398   :  { %v1508_v33 = vpop.eup %1507 }
 0x39c   :  { %v1510_v37 = vpop.eup %1509 }
 0x39d   :  { %v1512_v44 = vpop.eup %1511 }
 0x3a0   :  { %v1514_v46 = vpop.eup %1513 }
 0x3ba   :  { %v1405_v14 = vpop.f32.mrf.mxu0 }
 0x3bb   :  { %v773_v50 = vmul.f32 %v1514_v46, %v1405_v14  ;;  %v1050_v14 = vld [vmem:[%s1901_s4 + $0x78] sm:$0xff]  ;;  %v1036_v46 = vld [vmem:[%s1901_s4 + $0x8] sm:$0xff] }
 0x3bc   :  { %v731_v17 = vpop.f32.mrf.mxu0  ;;  %1437 = vmatprep.subr.mxu1 %v1050_v14 }
 0x3bd   :  { %v771_v45 = vmul.f32 %v1512_v44, %v731_v17  ;;  %1438 = vmatpush3.msra.mxu1 %v1050_v14  ;;  %v1047_v17 = vld [vmem:[%s1901_s4 + $0x60] sm:$0xff]  ;;  %v1038_v44 = vld [vmem:[%s1901_s4 + $0x18] sm:$0xff] }
 0x3be   :  { %v1408_v19 = vpop.f32.mrf.mxu0  ;;  %1439 = vmatprep.subr.mxu1 %v1049_v15 }
 0x3bf   :  { %v777_v21 = vmul.f32 %v1500_v18, %v1408_v19  ;;  %1440 = vmatpush3.msra.mxu1 %v1049_v15  ;;  %v1046_v18 = vld [vmem:[%s1901_s4 + $0x58] sm:$0xff]  ;;  %v1045_v19 = vld [vmem:[%s1901_s4 + $0x50] sm:$0xff] }
 0x3c0   :  { %v741_v23 = vpop.f32.mrf.mxu0  ;;  %1441 = vmatprep.subr.mxu1 %v1048_v16  ;;  %v1244_v15 = vld [vmem:[#allocation7 + $0x6] ss:$0 sm:$0xff] }
 0x3c1   :  { %v775_v24 = vmul.f32 %v1502_v22, %v741_v23  ;;  %790 = vrot.lane.b32.xlu0 %v777_v21, %s1612_s27  ;;  %1442 = vmatpush3.msra.mxu1 %v1048_v16  ;;  %v1043_v21 = vld [vmem:[%s1901_s4 + $0x40] sm:$0xff]  ;;  %v1042_v22 = vld [vmem:[%s1901_s4 + $0x38] sm:$0xff]  ;;  %v1041_v23 = vld [vmem:[%s1901_s4 + $0x30] sm:$0xff] }
 0x3c2   :  { %v1411_v25 = vpop.f32.mrf.mxu0  ;;  %1443 = vmatprep.subr.mxu1 %v1047_v17 }
 0x3c3   :  { %788 = vrot.lane.b32.xlu1 %v775_v24, %s1612_s27  ;;  %v781_v28 = vmul.f32 %v1504_v26, %v1411_v25  ;;  %1444 = vmatpush3.msra.mxu1 %v1047_v17  ;;  %v1040_v24 = vld [vmem:[%s1901_s4 + $0x28] sm:$0xff]  ;;  %v1039_v25 = vld [vmem:[%s1901_s4 + $0x20] sm:$0xff] }
 0x3c4   :  { %v751_v27 = vpop.f32.mrf.mxu0  ;;  %1445 = vmatprep.subr.mxu1 %v1046_v18 }
 0x3c5   :  { %v779_v35 = vmul.f32 %v1508_v33, %v751_v27  ;;  %1446 = vmatpush3.msra.mxu1 %v1046_v18  ;;  %v1245_v18 = vld [vmem:[#allocation7 + $0x7] ss:$0 sm:$0xff] }
 0x3c6   :  { %v1414_v29 = vpop.f32.mrf.mxu0  ;;  %1447 = vmatprep.subr.mxu1 %v1045_v19 }
 0x3c7   :  { %798 = vrot.lane.b32.xlu1 %v781_v28, %s1617_s21  ;;  %v785_v38 = vmul.f32 %v1510_v37, %v1414_v29  ;;  %1448 = vmatpush3.msra.mxu1 %v1045_v19  ;;  %v1239_v37 = vld [vmem:[#allocation7 + $0x5] ss:$0 sm:$0xff] }
 0x3c8   :  { %v761_v34 = vpop.f32.mrf.mxu0  ;;  %1449 = vmatprep.subr.mxu1 %v1044_v20 }
 0x3c9   :  { %v783_v36 = vmul.f32 %v1506_v31, %v761_v34  ;;  %1450 = vmatpush3.msra.mxu1 %v1044_v20 }
 0x3ca   :  { %1451 = vmatprep.subr.mxu1 %v1043_v21 }
 0x3cb   :  { %796 = vrot.lane.b32.xlu1 %v779_v35, %s1617_s21  ;;  %804 = vrot.lane.b32.xlu0 %v783_v36, %s1618_s2  ;;  %v1238_v35 = vld [vmem:[#allocation7 + $0x4] ss:$0 sm:$0xff] }
 0x3cc   :  { %1452 = vmatpush3.msra.mxu1 %v1043_v21 }
 0x3cd   :  { %1453 = vmatprep.subr.mxu1 %v1042_v22 }
 0x3ce   :  { %1454 = vmatpush3.msra.mxu1 %v1042_v22 }
 0x3cf   :  { %806 = vrot.lane.b32.xlu1 %v785_v38, %s1618_s2  ;;  %1455 = vmatprep.subr.mxu1 %v1041_v23 }
 0x3d0   :  { %1456 = vmatpush3.msra.mxu1 %v1041_v23 }
 0x3d1   :  { %1457 = vmatprep.subr.mxu1 %v1040_v24 }
 0x3d2   :  { %1458 = vmatpush3.msra.mxu1 %v1040_v24 }
 0x3d3   :  { %1459 = vmatprep.subr.mxu1 %v1039_v25 }
 0x3d4   :  { %1460 = vmatpush3.msra.mxu1 %v1039_v25 }
 0x3d5   :  { %1461 = vmatprep.subr.mxu1 %v1038_v44 }
 0x3d6   :  { %1462 = vmatpush3.msra.mxu1 %v1038_v44 }
 0x433   :  { %v791_v42 = vpop.permute.xlu0 %790 }
 0x434   :  { %v811_v53 = vsel %vm406_vm1, %v773_v50, %v791_v42 }
 0x435   :  { %v789_v41 = vpop.permute.xlu1 %788 }
 0x436   :  { %v810_v47 = vsel %vm406_vm1, %v771_v45, %v789_v41  ;;  %v1037_v45 = vld [vmem:[%s1901_s4 + $0x10] sm:$0xff] }
 0x437   :  { %1463 = vmatprep.subr.mxu1 %v1037_v45 }
 0x438   :  { %1464 = vmatpush3.msra.mxu1 %v1037_v45 }
 0x439   :  { %v799_v43 = vpop.permute.xlu1 %798  ;;  %1465 = vmatprep.subr.mxu1 %v1036_v46 }
 0x43a   :  { %v814_v54 = vsel %vm812_vm4, %v811_v53, %v799_v43  ;;  %1466 = vmatpush3.msra.mxu1 %v1036_v46 }
 0x43d   :  { %v805_v48 = vpop.permute.xlu0 %804  ;;  %v797_v49 = vpop.permute.xlu1 %796 }
 0x43e   :  { %v813_v51 = vsel %vm812_vm4, %v810_v47, %v797_v49  ;;  %v1035_v47 = vld [vmem:[%s1901_s4] sm:$0xff]  ;;  %s1619_s4 = smov [#allocation8]  }
 0x43f   :  { %v816_v52 = vsel %vm815_vm3, %v813_v51, %v805_v48  ;;  %1467 = vmatprep.subr.mxu1 %v1035_v47  ;;  %v1240_v48 = vld [vmem:[#allocation7 + $0x9] ss:$0 sm:$0xff]  ;;  %s1177_s12 = sshll.u32 %s1619_s4, 4  ;;  %s1178_s12 = int_to_ptr.vmem [resolvable:$true] %s1177_s12 }
 0x440   :  { %1423 = vmatprep.mubr.msk.f32.mxu0 %vm106_vm0, %v816_v52  ;;  %1468 = vmatpush3.msra.mxu1 %v1035_v47  ;;  %s1583_s0 = scalar_lea.vmem %s1178_s12, 256  ;;  %p1588_p2 = scmp.lt.s32.totalorder %s1178_s12, %s1178_s12 }
 0x441   :  { %v807_v55 = vpop.permute.xlu1 %806  ;;  %p1584_p1 = scmp.ne.s32.totalorder %s1178_s12, %s1583_s0  ;;  %p1589_p3 = scmp.lt.s32.totalorder %s1583_s0, %s1583_s0 }
 0x442   :  { %v817_v56 = vsel %vm815_vm3, %v814_v54, %v807_v55  ;;  %v1243_v55 = vld [vmem:[#allocation7 + $0x8] ss:$0 sm:$0xff] }
 0x443   :  { %1424 = vmatmul.mubr.msk.f32.vlgmr.msra.gmra.mxu0 %vm106_vm0, %v817_v56  ;;  %p1590_p4 = por %p1589_p3, %p1588_p2 }
 0x444   :  { %1427 = vmatpush3.msra.mxu0 %v947_v10 }
 0x445   :  { %1428 = vmatprep.subr.mxu0 %v946_v11  ;;  %p1591_p5 = pnand %p1590_p4, %p1584_p1 }
 0x446   :  { %1429 = vmatpush3.msra.mxu0 %v946_v11 }
 0x447   :  { %1430 = vmatprep.subr.mxu0 %v945_v12 }
 0x448   :  { %1431 = vmatpush3.msra.mxu0 %v945_v12 }
 0x449   :  { %1432 = vmatprep.subr.mxu0 %v944_v13 }
 0x44a   :  { %1433 = vmatpush3.msra.mxu0 %v944_v13 }
 0x503   :  { %v1425_v58 = vpop.f32.mrf.mxu0 }
 0x504   :  { %v900_v59 = vadd.f32 %v1425_v58, %v1235_v57 }
 0x505   :  { %v894_v60 = vpop.f32.mrf.mxu0 }
 0x506   :  { %v895_v61 = vadd.f32 %v1235_v57, %v894_v60  ;;  %v904_v62 = vadd.f32 %v900_v59, %v1689_v5 }
 0x508   :  { %v908_v63 = vsel %vm106_vm0, %v904_v62, 0.0  ;;  %v903_v0 = vadd.f32 %v895_v61, %v1679_v2 }
 0x509   :  { %909 = vadd.xlane.f32.xlu1 %v908_v63 }
 0x50a   :  { %v905_v30 = vsel %vm106_vm0, %v903_v0, 0.0 }
 0x50b   :  { %906 = vadd.xlane.f32.xlu0 %v905_v30 }
 0x592   :  { %v910_v1 = vpop.xlane.xlu1 %909 }
 0x593   :  { %v913_v32 = vmul.f32 0.03125, %v910_v1 }
 0x594   :  { %v907_v3 = vpop.xlane.xlu0 %906 }
 0x595   :  { %v912_v4 = vmul.f32 0.03125, %v907_v3  ;;  %v1811_v6 = vsub.f32 %v904_v62, %v913_v32 }
 0x597   :  { %v1813_v7 = vsub.f32 %v903_v0, %v912_v4  ;;  %v917_v2 = vmul.f32 %v1811_v6, %v1811_v6 }
 0x599   :  { %v916_v8 = vmul.f32 %v1813_v7, %v1813_v7  ;;  %v921_v9 = vsel %vm106_vm0, %v917_v2, 0.0 }
 0x59b   :  { %v918_v5 = vsel %vm106_vm0, %v916_v8, 0.0 }
 0x59c   :  { %919 = vadd.xlane.f32.xlu0 %v918_v5 }
 0x5a0   :  { %922 = vadd.xlane.f32.xlu0 %v921_v9 }
 0x625   :  { %v920_v26 = vpop.xlane.xlu0 %919 }
 0x626   :  { %v924_v27 = vmul.f32 0.03125, %v920_v26 }
 0x628   :  { %v926_v28 = vadd.f32 1e-05, %v924_v27 }
 0x629   :  { %v923_v29 = vpop.xlane.xlu0 %922 }
 0x62a   :  { %1515 = vrsqrt.f32 %v926_v28  ;;  %v925_v31 = vmul.f32 0.03125, %v923_v29 }
 0x62c   :  { %v927_v33 = vadd.f32 1e-05, %v925_v31 }
 0x62e   :  { %1517 = vrsqrt.f32 %v927_v33 }
 0x637   :  { %v1516_v34 = vpop.eup %1515 }
 0x638   :  { %v930_v36 = vmul.f32 %v1516_v34, %v1813_v7 }
 0x63a   :  { %v936_v38 = vmul.f32 %v1238_v35, %v930_v36 }
 0x63b   :  { %v1518_v39 = vpop.eup %1517 }
 0x63c   :  { %v931_v40 = vmul.f32 %v1518_v39, %v1811_v6  ;;  %v942_v41 = vadd.f32 %v1239_v37, %v936_v38 }
 0x63e   :  { %v937_v42 = vmul.f32 %v1238_v35, %v931_v40  ;;  %1434 = vmatprep.mubr.msk.f32.mxu0 %vm106_vm0, %v942_v41 }
 0x640   :  { %v943_v43 = vadd.f32 %v1239_v37, %v937_v42 }
 0x642   :  { %1435 = vmatmul.mubr.msk.f32.vlgmr.msra.gmra.mxu0 %vm106_vm0, %v943_v43 }
 0x702   :  { %v1436_v49 = vpop.f32.mrf.mxu0 }
 0x703   :  { %v1030_v50 = vadd.f32 %v1436_v49, %v1240_v48 }
 0x704   :  { %v1024_v51 = vpop.f32.mrf.mxu0 }
 0x705   :  { %v1025_v52 = vadd.f32 %v1240_v48, %v1024_v51  ;;  %v1034_v54 = vmax.f32 %v1030_v50, 0.0 }
 0x707   :  { %v1033_v53 = vmax.f32 %v1025_v52, 0.0 }
 0x709   :  { %1469 = vmatprep.mubr.f32.mxu1 %v1033_v53 }
 0x70a   :  { %1470 = vmatmul.mubr.f32.vlgmr.msra.gmra.mxu1 %v1034_v54 }
 0x7ca   :  { %v1471_v56 = vpop.f32.mrf.mxu1 }
 0x7cb   :  { %v1127_v57 = vadd.f32 %v1471_v56, %v1243_v55 }
 0x7cc   :  { %v1121_v58 = vpop.f32.mrf.mxu1 }
 0x7cd   :  { %v1122_v59 = vadd.f32 %v1243_v55, %v1121_v58  ;;  %v1131_v60 = vadd.f32 %v1127_v57, %v943_v43 }
 0x7cf   :  { %v1135_v61 = vsel %vm106_vm0, %v1131_v60, 0.0  ;;  %v1130_v62 = vadd.f32 %v1122_v59, %v942_v41 }
 0x7d0   :  { %1136 = vadd.xlane.f32.xlu0 %v1135_v61 }
 0x7d1   :  { %v1132_v63 = vsel %vm106_vm0, %v1130_v62, 0.0 }
 0x7d2   :  { %1133 = vadd.xlane.f32.xlu1 %v1132_v63 }
 0x859   :  { %v1137_v0 = vpop.xlane.xlu0 %1136 }
 0x85a   :  { %v1139_v30 = vmul.f32 0.03125, %v1137_v0 }
 0x85b   :  { %v1134_v1 = vpop.xlane.xlu1 %1133 }
 0x85c   :  { %v1141_v32 = vsub.f32 %v1131_v60, %v1139_v30  ;;  %v1138_v3 = vmul.f32 0.03125, %v1134_v1 }
 0x85e   :  { %v1140_v4 = vsub.f32 %v1130_v62, %v1138_v3  ;;  %v1143_v6 = vmul.f32 %v1141_v32, %v1141_v32 }
 0x860   :  { %v1147_v7 = vsel %vm106_vm0, %v1143_v6, 0.0  ;;  %v1142_v8 = vmul.f32 %v1140_v4, %v1140_v4 }
 0x861   :  { %1148 = vadd.xlane.f32.xlu0 %v1147_v7 }
 0x862   :  { %v1144_v5 = vsel %vm106_vm0, %v1142_v8, 0.0 }
 0x863   :  { %1145 = vadd.xlane.f32.xlu1 %v1144_v5 }
 0x8ea   :  { %v1149_v2 = vpop.xlane.xlu0 %1148 }
 0x8eb   :  { %v1151_v9 = vmul.f32 0.03125, %v1149_v2 }
 0x8ec   :  { %v1146_v10 = vpop.xlane.xlu1 %1145 }
 0x8ed   :  { %v1153_v11 = vadd.f32 1e-05, %v1151_v9  ;;  %v1150_v12 = vmul.f32 0.03125, %v1146_v10 }
 0x8ef   :  { %1519 = vrsqrt.f32 %v1153_v11  ;;  %v1152_v13 = vadd.f32 1e-05, %v1150_v12 }
 0x8f1   :  { %1521 = vrsqrt.f32 %v1152_v13 }
 0x8fc   :  { %v1520_v14 = vpop.eup %1519 }
 0x8fd   :  { %v1157_v16 = vmul.f32 %v1520_v14, %v1141_v32 }
 0x8fe   :  { %v1522_v17 = vpop.eup %1521 }
 0x8ff   :  { %v1156_v19 = vmul.f32 %v1522_v17, %v1140_v4  ;;  %v1163_v20 = vmul.f32 %v1244_v15, %v1157_v16 }
 0x901   :  { %v1162_v21 = vmul.f32 %v1244_v15, %v1156_v19  ;;  %v1169_v22 = vadd.f32 %v1245_v18, %v1163_v20 }
 0x903   :  { %v1168_v23 = vadd.f32 %v1245_v18, %v1162_v21  ;;  %1171 = vst.msk [vmem:[#allocation8 + $0x8] sm:$0xff] %vm106_vm0, %v1169_v22 }
 0x905   :  { %1170 = vst.msk [vmem:[#allocation8] sm:$0xff] %vm106_vm0, %v1168_v23 }
 0x906   :  { %1594 = shalt.err (!%p1591_p5)
}
 0x907   :  { %1183 = dma.vmem_to_hbm [thread:$0]  %s1178_s12, 256, %s1903_s6, [#allocation4], %s1611_s26, %s1611_s26, %s1612_s27  }
 0x908   :  { %1607 = dma.done.wait [#allocation4], 256  }
 0x909   :  { %1608 = vsyncadd [#allocation4], 4294967040 }
 0x90a   :  { %1187 = vsyncpa [#allocation3], 1 }
 0x90b   :  { %1188 = vsyncpa [#allocation6], 1 }
 0x90c   :  { %1189 = vsyncpa [#allocation4], 1 }

</bundles_post_ra>
